<compile_context>
chip_gen: v5e
topology: v5e:2x2
jax: 0.10.0
libtpu: 0.0.40
codegen_flags: <defaults>
</compile_context>

<pallas_src>
import jax
import jax.numpy as jnp
from jax.experimental import pallas as pl
from jax.experimental.pallas import tpu as pltpu

# ---- problem sizes (small, consistent with the module's constructor) ----
BATCH = 16                # total rows; tiled over the grid
TILE_B = 8                # rows per grid step (sublane-aligned)
PARAM_DIM = 16
HIDDEN_DIM = 32
LATENT_DIM = 8
NUM_HIDDEN_LAYERS = 4
LOGVAR_LIMIT = 2.0
OUT_PAD = 128             # lane-dense output width: [mu | logvar | zero pad]


def _vae_encoder_kernel(x_ref, w_in_ref, w_hid_ref, w_head_ref,
                        b_lay_ref, head_ref, out_ref):
    """Fused MLP encoder for one (TILE_B, PARAM_DIM) batch tile.

    w_hid_ref : (H, NH*H)        hidden weights packed lane-wise.
    w_head_ref: (H, OUT_PAD)     [W_mu | W_logvar | 0] fused head weight.
    b_lay_ref : (TILE_B, (NH+1)*H)  [b_in | b_h0..b_h3] broadcast to sublanes.
    head_ref  : (3*TILE_B, OUT_PAD) rows [0:T]=head bias, [T:2T]=lo, [2T:3T]=hi.
    out_ref   : (TILE_B, OUT_PAD)   [mu | clamped logvar | 0].
    """
    H = HIDDEN_DIM

    # input layer + relu
    h = jnp.dot(x_ref[...], w_in_ref[...], preferred_element_type=jnp.float32)
    h = jnp.maximum(h + b_lay_ref[:, 0:H], 0.0)

    # hidden stack (static trip count -> fully unrolled, each matmul on MXU)
    for l in range(NUM_HIDDEN_LAYERS):
        w = w_hid_ref[:, l * H:(l + 1) * H]
        b = b_lay_ref[:, (l + 1) * H:(l + 2) * H]
        h = jnp.maximum(jnp.dot(h, w, preferred_element_type=jnp.float32) + b, 0.0)

    # fused output heads: one (H, OUT_PAD) matmul, one lane-dense store
    y = jnp.dot(h, w_head_ref[...], preferred_element_type=jnp.float32)
    y = y + head_ref[0:TILE_B, :]
    lo = head_ref[TILE_B:2 * TILE_B, :]
    hi = head_ref[2 * TILE_B:3 * TILE_B, :]
    out_ref[...] = jnp.minimum(jnp.maximum(y, lo), hi)


def dynamics_variational_encoder(x, packed_params):
    """x: (B, param_dim) f32.  Returns (mu, logvar), each (B, latent_dim)."""
    w_in, w_hid, w_head, b_lay, head_consts = packed_params
    B = x.shape[0]
    assert B % TILE_B == 0
    grid = (B // TILE_B,)

    # Weights / biases: constant block index -> resident in VMEM across steps.
    const2d = lambda shape: pl.BlockSpec(shape, lambda i: (0, 0))

    flops = 2 * B * (PARAM_DIM * HIDDEN_DIM
                     + NUM_HIDDEN_LAYERS * HIDDEN_DIM * HIDDEN_DIM
                     + HIDDEN_DIM * 2 * LATENT_DIM)
    bytes_accessed = 4 * (B * PARAM_DIM
                          + PARAM_DIM * HIDDEN_DIM
                          + HIDDEN_DIM * NUM_HIDDEN_LAYERS * HIDDEN_DIM
                          + HIDDEN_DIM * OUT_PAD
                          + TILE_B * (NUM_HIDDEN_LAYERS + 1) * HIDDEN_DIM
                          + 3 * TILE_B * OUT_PAD
                          + B * OUT_PAD)

    out = pl.pallas_call(
        _vae_encoder_kernel,
        out_shape=jax.ShapeDtypeStruct((B, OUT_PAD), jnp.float32),
        grid=grid,
        in_specs=[
            pl.BlockSpec((TILE_B, PARAM_DIM), lambda i: (i, 0)),                       # x (tiled)
            const2d((PARAM_DIM, HIDDEN_DIM)),                                          # w_in
            const2d((HIDDEN_DIM, NUM_HIDDEN_LAYERS * HIDDEN_DIM)),                     # w_hid packed
            const2d((HIDDEN_DIM, OUT_PAD)),                                            # w_head fused
            const2d((TILE_B, (NUM_HIDDEN_LAYERS + 1) * HIDDEN_DIM)),                   # layer biases
            const2d((3 * TILE_B, OUT_PAD)),                                            # head bias/lo/hi
        ],
        out_specs=pl.BlockSpec((TILE_B, OUT_PAD), lambda i: (i, 0)),
        compiler_params=pltpu.CompilerParams(dimension_semantics=("parallel",)),
        cost_estimate=pl.CostEstimate(flops=flops, transcendentals=0,
                                      bytes_accessed=bytes_accessed),
    )(x, w_in, w_hid, w_head, b_lay, head_consts)

    mu = out[:, :LATENT_DIM]
    logvar = out[:, LATENT_DIM:2 * LATENT_DIM]
    return mu, logvar


def pack_params(raw_params):
    """One-time packing of per-layer params into the kernel's operand form."""
    (w_in, b_in, w_h, b_h, w_mu, b_mu, w_lv, b_lv) = raw_params
    H, L, NH = HIDDEN_DIM, LATENT_DIM, NUM_HIDDEN_LAYERS

    # 4 hidden weights packed lane-wise into one (H, NH*H) = (32, 128) slab
    w_hid = jnp.concatenate([w_h[l] for l in range(NH)], axis=1)

    # fused, lane-padded head weight (H, OUT_PAD) = [W_mu | W_logvar | 0]
    w_head = jnp.zeros((H, OUT_PAD), jnp.float32)
    w_head = w_head.at[:, :L].set(w_mu).at[:, L:2 * L].set(w_lv)

    # layer biases: concat lane-wise, broadcast to TILE_B sublanes
    b_cat = jnp.concatenate([b_in.reshape(1, H)]
                            + [b_h[l].reshape(1, H) for l in range(NH)], axis=1)
    b_lay = jnp.broadcast_to(b_cat, (TILE_B, (NH + 1) * H))

    # head bias row + per-column clamp bounds (mu columns unbounded)
    b_head = jnp.zeros((1, OUT_PAD), jnp.float32)
    b_head = b_head.at[:, :L].set(b_mu.reshape(1, L)).at[:, L:2 * L].set(b_lv.reshape(1, L))
    lo = jnp.full((1, OUT_PAD), -jnp.inf, jnp.float32).at[:, L:2 * L].set(-LOGVAR_LIMIT)
    hi = jnp.full((1, OUT_PAD), jnp.inf, jnp.float32).at[:, L:2 * L].set(LOGVAR_LIMIT)
    head_consts = jnp.concatenate([
        jnp.broadcast_to(b_head, (TILE_B, OUT_PAD)),
        jnp.broadcast_to(lo, (TILE_B, OUT_PAD)),
        jnp.broadcast_to(hi, (TILE_B, OUT_PAD)),
    ], axis=0)                                           # (3*TILE_B, OUT_PAD)

    return (w_in, w_hid, w_head, jnp.asarray(b_lay), head_consts)


def init_params(key):
    """Deterministic synthetic parameter init (Kaiming-ish uniform scales)."""
    ks = jax.random.split(key, 8)

    def lin(k, fan_in, fan_out):
        bound = 1.0 / jnp.sqrt(jnp.float32(fan_in))
        kw, kb = jax.random.split(k)
        w = jax.random.uniform(kw, (fan_in, fan_out), jnp.float32, -bound, bound)
        b = jax.random.uniform(kb, (1, fan_out), jnp.float32, -bound, bound)
        return w, b

    w_in, b_in = lin(ks[0], PARAM_DIM, HIDDEN_DIM)
    w_hs, b_hs = [], []
    for l in range(NUM_HIDDEN_LAYERS):
        w, b = lin(ks[1 + l], HIDDEN_DIM, HIDDEN_DIM)
        w_hs.append(w)
        b_hs.append(b)
    w_h = jnp.stack(w_hs, axis=0)                       # (NH, H, H)
    b_h = jnp.stack(b_hs, axis=0)                       # (NH, 1, H)
    w_mu, b_mu = lin(ks[5], HIDDEN_DIM, LATENT_DIM)
    w_lv, b_lv = lin(ks[6], HIDDEN_DIM, LATENT_DIM)
    return (w_in, b_in, w_h, b_h, w_mu, b_mu, w_lv, b_lv)


def reference_forward(x, raw_params):
    """Pure-JAX reference (mirrors the PyTorch forward) for sanity checking."""
    (w_in, b_in, w_h, b_h, w_mu, b_mu, w_lv, b_lv) = raw_params
    h = jnp.maximum(x @ w_in + b_in, 0.0)
    for l in range(w_h.shape[0]):
        h = jnp.maximum(h @ w_h[l] + b_h[l], 0.0)
    mu = h @ w_mu + b_mu
    logvar = jnp.clip(h @ w_lv + b_lv, -LOGVAR_LIMIT, LOGVAR_LIMIT)
    return mu, logvar


if __name__ == "__main__":
    key = jax.random.PRNGKey(0)
    kx, kp = jax.random.split(key)
    x = jax.random.normal(kx, (BATCH, PARAM_DIM), jnp.float32)
    raw_params = init_params(kp)
    packed_params = pack_params(raw_params)

    mu, logvar = dynamics_variational_encoder(x, packed_params)
    jax.block_until_ready((mu, logvar))

    mu_ref, lv_ref = reference_forward(x, raw_params)
    assert mu.shape == (BATCH, LATENT_DIM) and logvar.shape == (BATCH, LATENT_DIM)
    assert jnp.allclose(mu, mu_ref, atol=1e-5, rtol=1e-5)
    assert jnp.allclose(logvar, lv_ref, atol=1e-5, rtol=1e-5)
    assert bool(jnp.all(logvar <= LOGVAR_LIMIT)) and bool(jnp.all(logvar >= -LOGVAR_LIMIT))

    print("KERNEL_OK")
</pallas_src>

<mosaic_0001>
module attributes {stable_mosaic.version = 11 : i64} {
  func.func @_vae_encoder_kernel(%arg0: i32, %arg1: memref<8x16xf32, #tpu.memory_space<vmem>>, %arg2: memref<16x32xf32, #tpu.memory_space<vmem>>, %arg3: memref<32x128xf32, #tpu.memory_space<vmem>>, %arg4: memref<32x128xf32, #tpu.memory_space<vmem>>, %arg5: memref<8x160xf32, #tpu.memory_space<vmem>>, %arg6: memref<24x128xf32, #tpu.memory_space<vmem>>, %arg7: memref<8x128xf32, #tpu.memory_space<vmem>>) attributes {dimension_semantics = [#tpu.dimension_semantics<parallel>], iteration_bounds = array<i64: 2>, scalar_prefetch = 0 : i64, scratch_operands = 0 : i64, tpu.core_type = #tpu.core_type<tc>, window_params = [{transform_indices = @transform_0, window_bounds = array<i64: 8, 16>}, {pipeline_mode = #tpu.pipeline_mode<synchronous>, transform_indices = @transform_1, window_bounds = array<i64: 16, 32>}, {pipeline_mode = #tpu.pipeline_mode<synchronous>, transform_indices = @transform_2, window_bounds = array<i64: 32, 128>}, {pipeline_mode = #tpu.pipeline_mode<synchronous>, transform_indices = @transform_3, window_bounds = array<i64: 32, 128>}, {pipeline_mode = #tpu.pipeline_mode<synchronous>, transform_indices = @transform_4, window_bounds = array<i64: 8, 160>}, {pipeline_mode = #tpu.pipeline_mode<synchronous>, transform_indices = @transform_5, window_bounds = array<i64: 24, 128>}, {transform_indices = @transform_6, window_bounds = array<i64: 8, 128>}]} {
    %c0 = arith.constant 0 : index
    %c0_0 = arith.constant 0 : index
    %0 = vector.load %arg1[%c0, %c0_0] : memref<8x16xf32, #tpu.memory_space<vmem>>, vector<8x16xf32>
    %c0_1 = arith.constant 0 : index
    %c0_2 = arith.constant 0 : index
    %1 = vector.load %arg2[%c0_1, %c0_2] : memref<16x32xf32, #tpu.memory_space<vmem>>, vector<16x32xf32>
    %cst = arith.constant dense<0.000000e+00> : vector<8x32xf32>
    %2 = tpu.matmul %0, %1, %cst {dimension_numbers = #tpu.dot_dimension_numbers<[1], [0], [0], [1], [0, 0, 1, 1], [], []>} : vector<8x16xf32>, vector<16x32xf32>, vector<8x32xf32> -> vector<8x32xf32>
    %c0_3 = arith.constant 0 : index
    %c0_4 = arith.constant 0 : index
    %3 = vector.load %arg5[%c0_3, %c0_4] : memref<8x160xf32, #tpu.memory_space<vmem>>, vector<8x32xf32>
    %4 = arith.addf %2, %3 : vector<8x32xf32>
    %cst_5 = arith.constant 0.000000e+00 : f32
    %5 = vector.broadcast %cst_5 : f32 to vector<8x32xf32>
    %6 = arith.maximumf %4, %5 : vector<8x32xf32>
    %c0_6 = arith.constant 0 : index
    %c0_7 = arith.constant 0 : index
    %7 = vector.load %arg3[%c0_6, %c0_7] : memref<32x128xf32, #tpu.memory_space<vmem>>, vector<32x32xf32>
    %c0_8 = arith.constant 0 : index
    %c32 = arith.constant 32 : index
    %8 = vector.load %arg5[%c0_8, %c32] : memref<8x160xf32, #tpu.memory_space<vmem>>, vector<8x32xf32>
    %cst_9 = arith.constant dense<0.000000e+00> : vector<8x32xf32>
    %9 = tpu.matmul %6, %7, %cst_9 {dimension_numbers = #tpu.dot_dimension_numbers<[1], [0], [0], [1], [0, 0, 1, 1], [], []>} : vector<8x32xf32>, vector<32x32xf32>, vector<8x32xf32> -> vector<8x32xf32>
    %10 = arith.addf %9, %8 : vector<8x32xf32>
    %cst_10 = arith.constant 0.000000e+00 : f32
    %11 = vector.broadcast %cst_10 : f32 to vector<8x32xf32>
    %12 = arith.maximumf %10, %11 : vector<8x32xf32>
    %c0_11 = arith.constant 0 : index
    %c32_12 = arith.constant 32 : index
    %13 = vector.load %arg3[%c0_11, %c32_12] : memref<32x128xf32, #tpu.memory_space<vmem>>, vector<32x32xf32>
    %c0_13 = arith.constant 0 : index
    %c64 = arith.constant 64 : index
    %14 = vector.load %arg5[%c0_13, %c64] : memref<8x160xf32, #tpu.memory_space<vmem>>, vector<8x32xf32>
    %cst_14 = arith.constant dense<0.000000e+00> : vector<8x32xf32>
    %15 = tpu.matmul %12, %13, %cst_14 {dimension_numbers = #tpu.dot_dimension_numbers<[1], [0], [0], [1], [0, 0, 1, 1], [], []>} : vector<8x32xf32>, vector<32x32xf32>, vector<8x32xf32> -> vector<8x32xf32>
    %16 = arith.addf %15, %14 : vector<8x32xf32>
    %cst_15 = arith.constant 0.000000e+00 : f32
    %17 = vector.broadcast %cst_15 : f32 to vector<8x32xf32>
    %18 = arith.maximumf %16, %17 : vector<8x32xf32>
    %c0_16 = arith.constant 0 : index
    %c64_17 = arith.constant 64 : index
    %19 = vector.load %arg3[%c0_16, %c64_17] : memref<32x128xf32, #tpu.memory_space<vmem>>, vector<32x32xf32>
    %c0_18 = arith.constant 0 : index
    %c96 = arith.constant 96 : index
    %20 = vector.load %arg5[%c0_18, %c96] : memref<8x160xf32, #tpu.memory_space<vmem>>, vector<8x32xf32>
    %cst_19 = arith.constant dense<0.000000e+00> : vector<8x32xf32>
    %21 = tpu.matmul %18, %19, %cst_19 {dimension_numbers = #tpu.dot_dimension_numbers<[1], [0], [0], [1], [0, 0, 1, 1], [], []>} : vector<8x32xf32>, vector<32x32xf32>, vector<8x32xf32> -> vector<8x32xf32>
    %22 = arith.addf %21, %20 : vector<8x32xf32>
    %cst_20 = arith.constant 0.000000e+00 : f32
    %23 = vector.broadcast %cst_20 : f32 to vector<8x32xf32>
    %24 = arith.maximumf %22, %23 : vector<8x32xf32>
    %c0_21 = arith.constant 0 : index
    %c96_22 = arith.constant 96 : index
    %25 = vector.load %arg3[%c0_21, %c96_22] : memref<32x128xf32, #tpu.memory_space<vmem>>, vector<32x32xf32>
    %c0_23 = arith.constant 0 : index
    %c128 = arith.constant 128 : index
    %26 = vector.load %arg5[%c0_23, %c128] : memref<8x160xf32, #tpu.memory_space<vmem>>, vector<8x32xf32>
    %cst_24 = arith.constant dense<0.000000e+00> : vector<8x32xf32>
    %27 = tpu.matmul %24, %25, %cst_24 {dimension_numbers = #tpu.dot_dimension_numbers<[1], [0], [0], [1], [0, 0, 1, 1], [], []>} : vector<8x32xf32>, vector<32x32xf32>, vector<8x32xf32> -> vector<8x32xf32>
    %28 = arith.addf %27, %26 : vector<8x32xf32>
    %cst_25 = arith.constant 0.000000e+00 : f32
    %29 = vector.broadcast %cst_25 : f32 to vector<8x32xf32>
    %30 = arith.maximumf %28, %29 : vector<8x32xf32>
    %c0_26 = arith.constant 0 : index
    %c0_27 = arith.constant 0 : index
    %31 = vector.load %arg4[%c0_26, %c0_27] : memref<32x128xf32, #tpu.memory_space<vmem>>, vector<32x128xf32>
    %cst_28 = arith.constant dense<0.000000e+00> : vector<8x128xf32>
    %32 = tpu.matmul %30, %31, %cst_28 {dimension_numbers = #tpu.dot_dimension_numbers<[1], [0], [0], [1], [0, 0, 1, 1], [], []>} : vector<8x32xf32>, vector<32x128xf32>, vector<8x128xf32> -> vector<8x128xf32>
    %c0_29 = arith.constant 0 : index
    %c0_30 = arith.constant 0 : index
    %33 = vector.load %arg6[%c0_29, %c0_30] : memref<24x128xf32, #tpu.memory_space<vmem>>, vector<8x128xf32>
    %34 = arith.addf %32, %33 : vector<8x128xf32>
    %c8 = arith.constant 8 : index
    %c0_31 = arith.constant 0 : index
    %35 = vector.load %arg6[%c8, %c0_31] : memref<24x128xf32, #tpu.memory_space<vmem>>, vector<8x128xf32>
    %c16 = arith.constant 16 : index
    %c0_32 = arith.constant 0 : index
    %36 = vector.load %arg6[%c16, %c0_32] : memref<24x128xf32, #tpu.memory_space<vmem>>, vector<8x128xf32>
    %37 = arith.maximumf %34, %35 : vector<8x128xf32>
    %38 = arith.minimumf %37, %36 : vector<8x128xf32>
    %c0_33 = arith.constant 0 : index
    %c0_34 = arith.constant 0 : index
    %39 = vector.load %arg7[%c0_33, %c0_34] : memref<8x128xf32, #tpu.memory_space<vmem>>, vector<8x128xf32>
    tpu.vector_store %arg7[%c0_33, %c0_34], %38 {strides = array<i32>} : memref<8x128xf32, #tpu.memory_space<vmem>>, vector<8x128xf32>,
    return
  }
  func.func @transform_0(%arg0: i32) -> (i32, i32) {
    %c0_i32 = arith.constant 0 : i32
    %c0_i32_0 = arith.constant 0 : i32
    return %arg0, %c0_i32 : i32, i32
  }
  func.func @transform_1(%arg0: i32) -> (i32, i32) {
    %c0_i32 = arith.constant 0 : i32
    %c0_i32_0 = arith.constant 0 : i32
    %c0_i32_1 = arith.constant 0 : i32
    return %c0_i32, %c0_i32_0 : i32, i32
  }
  func.func @transform_2(%arg0: i32) -> (i32, i32) {
    %c0_i32 = arith.constant 0 : i32
    %c0_i32_0 = arith.constant 0 : i32
    %c0_i32_1 = arith.constant 0 : i32
    return %c0_i32, %c0_i32_0 : i32, i32
  }
  func.func @transform_3(%arg0: i32) -> (i32, i32) {
    %c0_i32 = arith.constant 0 : i32
    %c0_i32_0 = arith.constant 0 : i32
    %c0_i32_1 = arith.constant 0 : i32
    return %c0_i32, %c0_i32_0 : i32, i32
  }
  func.func @transform_4(%arg0: i32) -> (i32, i32) {
    %c0_i32 = arith.constant 0 : i32
    %c0_i32_0 = arith.constant 0 : i32
    %c0_i32_1 = arith.constant 0 : i32
    return %c0_i32, %c0_i32_0 : i32, i32
  }
  func.func @transform_5(%arg0: i32) -> (i32, i32) {
    %c0_i32 = arith.constant 0 : i32
    %c0_i32_0 = arith.constant 0 : i32
    %c0_i32_1 = arith.constant 0 : i32
    return %c0_i32, %c0_i32_0 : i32, i32
  }
  func.func @transform_6(%arg0: i32) -> (i32, i32) {
    %c0_i32 = arith.constant 0 : i32
    %c0_i32_0 = arith.constant 0 : i32
    return %arg0, %c0_i32 : i32, i32
  }
}

</mosaic_0001>

<bundles_post_ra>
// kernel: tpu_custom_call.1
= control target key start
LH: loop header
LB: loop body
LE: loop exit
PB: predicated region body
PF: predicated region fallthrough
CT: control target
= control target key end

     0   :  { %11 = vsyncpa [#allocation3], 0  ;;  %s1342_s0 = inlined_call_operand.hbm [shape: f32[16,16], index: 0, kind: input, shape index: {}]   ;;  %s1343_s1 = inlined_call_operand.hbm [shape: f32[16,32], index: 1, kind: input, shape index: {}]   ;;  %s1344_s2 = inlined_call_operand.hbm [shape: f32[32,128], index: 2, kind: input, shape index: {}]   ;;  %s1345_s3 = inlined_call_operand.hbm [shape: f32[32,128], index: 3, kind: input, shape index: {}]   ;;  %s1346_s4 = inlined_call_operand.hbm [shape: f32[8,160], index: 4, kind: input, shape index: {}]   ;;  %s1347_s5 = inlined_call_operand.hbm [shape: f32[24,128], index: 5, kind: input, shape index: {}]   ;;  %s1348_s6 = inlined_call_operand.hbm [shape: f32[16,128], index: 6, kind: output, shape index: {}]  }
   0x1   :  { %13 = vsyncpa [#allocation3 + $0x1], 0 }
   0x2   :  { %14 = vsyncpa [#allocation6], 0 }
   0x3   :  { %15 = vsyncpa [#allocation9], 0 }
   0x4   :  { %16 = vsyncpa [#allocation12], 0 }
   0x5   :  { %17 = vsyncpa [#allocation4], 0 }
   0x6   :  { %19 = vsyncpa [#allocation4 + $0x1], 0  ;;  %s1163_s21 = smov 0   ;;  %s1165_s22 = smov 0  }
   0x7   :  { %s1167_s23 = smov 0   ;;  %s1169_s24 = smov 0  }
   0x8 LB: > { %s198_s27 = sshll.u32 %s1343_s1, 4  ;;  %s1187_s28 = sadd.s32 4294967295, %s1116_s24   ;;  %s1116_s24 = sphi %s1169_s24, %s1359_s24   ;;  %s1112_s23 = sphi %s1167_s23, %s1358_s23   ;;  %s1108_s22 = sphi %s1165_s22, %s1357_s22   ;;  %s1104_s21 = sphi %s1163_s21, %s1356_s21   ;;  %s199_s27 = int_to_ptr.hbm [resolvable:$true] %s198_s27 }
   0x9   : > { %p699_p0 = scmp.ge.s32.totalorder %s1116_s24, 1  ;;  %p46_p1 = scmp.eq.s32.totalorder %s1187_s28, 0 }
   0xa   : > { %p187_p2 = scmp.lt.s32.totalorder %s1116_s24, 3  ;;  %s1118_s30 = smov [#allocation5]  }
   0xb   : > { %s200_s7 = sshll.u32 %s1118_s30, 4  ;;  %s226_s10 = sshll.u32 %s1345_s3, 4  ;;  %s201_s7 = int_to_ptr.vmem [resolvable:$true] %s200_s7  ;;  %s227_s10 = int_to_ptr.hbm [resolvable:$true] %s226_s10 }
   0xc   : > { %p1192_p3 = pnand %p699_p0, %p187_p2  ;;  %s212_s14 = sshll.u32 %s1344_s2, 4  ;;  %s213_s14 = int_to_ptr.hbm [resolvable:$true] %s212_s14 }
   0xd   : > { %s1119_s15 = smov [#allocation8]   ;;  %s1120_s17 = smov 128  }
   0xe   : > { %p750_p4 = pneg %p1192_p3  ;;  %s228_s16 = sshll.u32 %s1119_s15, 4  ;;  %s229_s16 = int_to_ptr.vmem [resolvable:$true] %s228_s16 }
   0xf   : > { %s1121_s18 = smov 8   ;;  %s241_s25 = sshll.u32 %s1346_s4, 4  ;;  %s242_s25 = int_to_ptr.hbm [resolvable:$true] %s241_s25 }
  0x10   : > { %p1204_p6 = pnand %p750_p4, %p46_p1  ;;  %s1122_s26 = smov [#allocation7]  }
  0x11   : > { %s214_s30 = sshll.u32 %s1122_s26, 4  ;;  %s1124_s12 = smov [#allocation11]   ;;  %s215_s30 = int_to_ptr.vmem [resolvable:$true] %s214_s30 }
  0x12   : > { %753 = dma.hbm_to_vmem [thread:$0]  (!%p1204_p6), %s199_s27, 256, %s201_s7, [#allocation6], %s1120_s17, %s1120_s17, %s1121_s18  }
  0x13   : > { %759 = dma.hbm_to_vmem [thread:$0]  (!%p1204_p6), %s227_s10, 512, %s229_s16, [#allocation9], %s1120_s17, %s1120_s17, %s1121_s18  }
  0x14   : > { %756 = dma.hbm_to_vmem [thread:$0]  (!%p1204_p6), %s213_s14, 512, %s215_s30, [#allocation6], %s1120_s17, %s1120_s17, %s1121_s18  }
  0x15   : > { %s1123_s27 = smov [#allocation10]   ;;  %s252_s10 = sshll.u32 %s1347_s5, 4  ;;  %s253_s10 = int_to_ptr.hbm [resolvable:$true] %s252_s10 }
  0x16   : > { %s243_s7 = sshll.u32 %s1123_s27, 4  ;;  %s254_s13 = sshll.u32 %s1124_s12, 4  ;;  %s244_s7 = int_to_ptr.vmem [resolvable:$true] %s243_s7  ;;  %s255_s13 = int_to_ptr.vmem [resolvable:$true] %s254_s13 }
  0x17   : > { %762 = dma.hbm_to_vmem [thread:$0]  (!%p1204_p6), %s242_s25, 256, %s244_s7, [#allocation9]  }
  0x18   : > { %765 = dma.hbm_to_vmem [thread:$0]  (!%p1204_p6), %s253_s10, 384, %s255_s13, [#allocation12], %s1120_s17, %s1120_s17, %s1121_s18  }
  0x19   : > { %s698_s14 = sadd.s32 4294967294, %s1116_s24   ;;  %s1229_s15 = sadd.s32 1, %s1116_s24  }
  0x1a   : > { %s32_s16 = sadd.s32 1, %s1112_s23  ;;  %s29_s19 = ssub.s32 %s1116_s24, %s1229_s15 }
  0x1b   : > { %p39_p7 = scmp.ne.s32.totalorder %s1112_s23, %s1108_s22  ;;  %p30_p8 = scmp.eq.s32.totalorder %s29_s19, 0 }
  0x1c   : > { %p40_p9 = scmp.eq.s32.totalorder %s1116_s24, 0  ;;  %p45_p10 = scmp.ne.s32.totalorder %s1108_s22, %s1104_s21 }
  0x1d   : > { %p174_p11 = scmp.eq.s32.totalorder %s1187_s28, 1  ;;  %p180_p0 = scmp.eq.s32.totalorder %s698_s14, 1 }
  0x1e   : > { %s1241_s20 = scalar_select %p30_p8, %s1112_s23, %s32_s16  }
  0x1f   : > { %p1245_p12 = por %p46_p1, %p45_p10  ;;  %p1249_p13 = por %p174_p11, %p39_p7 }
  0x20   : > { %p41_p2 = por %p40_p9, %p39_p7  ;;  %s268_s18 = sand.u32 1, %s1112_s23  }
  0x21   : > { %p1254_p4 = por %p180_p0, %p45_p10  ;;  %p779_p6 = scmp.lt.s32.totalorder %s1116_s24, 2 }
  0x22   : > { %s706_s26 = sshll.u32 %s268_s18, 3  ;;  %s707_s30 = sshll.u32 %s1116_s24, 3 }
  0x23   : > { %s276_s8 = scalar_lea.hbm %s1342_s0, %s707_s30  ;;  %s272_s10 = scalar_lea.vmem [#allocation2], %s706_s26 }
  0x24   : > { %s278_s9 = sshll.u32 %s276_s8, 4  ;;  %s280_s12 = sshll.u32 %s272_s10, 4  ;;  %s279_s9 = int_to_ptr.hbm [resolvable:$true] %s278_s9  ;;  %s281_s12 = int_to_ptr.vmem [resolvable:$true] %s280_s12 }
  0x25   : > { %p1263_p8 = pnand %p779_p6, %p41_p2  ;;  %s269_s14 = scalar_lea.sflag [#allocation3], %s268_s18 }
  0x26   : > { %s1008_s16 = sshra.s32 %s279_s9, 4  ;;  %s1015_s26 = scalar_lea.hbm %s1342_s0, 16  ;;  %s1009_s16 = int_to_ptr.hbm [resolvable:$true] %s1008_s16 }
  0x27   : > { %s1010_s19 = scalar_lea.hbm %s1009_s16, 8  ;;  %p1012_p9 = pneg %p1263_p8 }
  0x28   : > { %p1011_p7 = scmp.ne.s32.totalorder %s1009_s16, %s1010_s19  ;;  %p1016_p0 = scmp.lt.s32.totalorder %s1009_s16, %s1342_s0 }
  0x29   : > { %p1017_p2 = scmp.lt.s32.totalorder %s1015_s26, %s1010_s19 }
  0x2a   : > { %p1013_p10 = pnand %p1012_p9, %p1011_p7 }
  0x2b   : > { %p1018_p6 = por %p1017_p2, %p1016_p0 }
  0x2c   : > { %p1014_p11 = pneg %p1013_p10 }
  0x2e   : > { %p1019_p5 = pnand %p1018_p6, %p1014_p11 }
  0x30   : > { %1022 = shalt.err (!%p1019_p5)
}
  0x31   : > { %769 = dma.hbm_to_vmem [thread:$0]  (!%p1263_p8), %s279_s9, 128, %s281_s12, %s269_s14  }
  0x32   : > { %289 = sbr.rel (%p1192_p3) target bundleno = 863 (0x35f), region = 44  ;;  %s1280_s18 = sand.u32 (!%p1192_p3), 1, %s1108_s22  }
  0x33   : > { %s709_s10 = sshll.u32 (!%p1192_p3), %s1280_s18, 3  ;;  %s292_s30 = scalar_lea.sflag (!%p1192_p3), [#allocation3], %s1280_s18 }
  0x34   : > { %s295_s16 = scalar_lea.vmem (!%p1192_p3), [#allocation2], %s709_s10 }
  0x37   : > { %1083 = dma.done.wait (%p1245_p12), %s292_s30, 128  }
  0x38   : > { %1085 = vsyncadd (%p1245_p12), %s292_s30, 4294967168 }
  0x39   : > { %1087 = dma.done.wait (%p46_p1), [#allocation6], 768  }
  0x3a   : > { %1089 = vsyncadd (%p46_p1), [#allocation6], 4294966528 }
  0x3b   : > { %1091 = dma.done.wait (%p46_p1), [#allocation9], 768  }
  0x3c   : > { %1093 = vsyncadd (%p46_p1), [#allocation9], 4294966528 }
  0x3d   : > { %1095 = dma.done.wait (%p46_p1), [#allocation12], 384  }
  0x3e   : > { %1097 = vsyncadd (%p46_p1), [#allocation12], 4294966912  ;;  %v352_v0 = vld [vmem:[#allocation5 + $0x8] sm:$0xff]  ;;  %v351_v1 = vld [vmem:[#allocation5] sm:$0xff]  ;;  %vm354_vm0 = vcmask 130048   ;;  %s1125_s29 = smov 96  }
  0x3f   : > { %372 = vmatpush.msra.mxu0 %v352_v0  ;;  %v350_v2 = vld [vmem:[%s295_s16] sm:$0xff]  ;;  %v382_v3 = vld [vmem:[#allocation7 + $0x18] sm:$0xff]  ;;  %v381_v4 = vld [vmem:[#allocation7 + $0x10] sm:$0xff]  ;;  %vm387_vm1 = vcmask 261120   ;;  %s1126_s11 = smov 64   ;;  %s1127_s9 = smov 32  }
  0x40   : > { %403 = vmatpush.msra.mxu1 %v382_v3  ;;  %v380_v5 = vld [vmem:[#allocation7 + $0x8] sm:$0xff]  ;;  %v379_v6 = vld [vmem:[#allocation7] sm:$0xff]  ;;  %v828_v7 = vpack.i.bf16 %v381_v4, %v382_v3  ;;  %v534_v39 = vld [vmem:[#allocation8 + $0x18] sm:$0xff]  ;;  %s723_s12 = sshll.u32 %s1187_s28, 3  ;;  %s349_s27 = scalar_lea.vmem [#allocation13], %s709_s10 }
  0x41   : > { %373 = vmatpush.msra.mxu0 %v351_v1  ;;  %v833_v8 = vpack.i.bf16 %v379_v6, %v380_v5  ;;  %v353_v9 = vld [vmem:[#allocation10] sm:$0xff]  ;;  %v533_v40 = vld [vmem:[#allocation8 + $0x10] sm:$0xff]  ;;  %v532_v45 = vld [vmem:[#allocation8 + $0x8] sm:$0xff]  ;;  %s575_s19 = scalar_lea.hbm %s1348_s6, %s723_s12  ;;  %s577_s26 = sshll.u32 %s349_s27, 4  ;;  %s578_s26 = int_to_ptr.vmem [resolvable:$true] %s577_s26 }
  0x42   : > { %716 = vmatmul.msk.f32.vlgmr.msra.gmra.mxu0 %vm354_vm0, %v350_v2  ;;  %404 = vmatpush.msra.mxu1 %v381_v4  ;;  %v531_v46 = vld [vmem:[#allocation8] sm:$0xff]  ;;  %v494_v47 = vld [vmem:[#allocation10 + $0x8] sm:$0xff]  ;;  %v535_v51 = vld [vmem:[#allocation11] sm:$0xff]  ;;  %s579_s7 = sshll.u32 %s575_s19, 4  ;;  %s565_s28 = scalar_lea.sflag [#allocation4], %s1280_s18  ;;  %s580_s7 = int_to_ptr.hbm [resolvable:$true] %s579_s7 }
  0x43   : > { %829 = vrot.lane.b32.xlu0 %v828_v7, %s1125_s29  ;;  %834 = vrot.lane.b32.xlu1 %v833_v8, %s1125_s29  ;;  %v559_v53 = vld [vmem:[#allocation11 + $0x8] sm:$0xff]  ;;  %v560_v55 = vld [vmem:[#allocation11 + $0x10] sm:$0xff]  ;;  %s1052_s8 = sshra.s32 %s580_s7, 4  ;;  %s1053_s8 = int_to_ptr.hbm [resolvable:$true] %s1052_s8 }
  0x44   : > { %405 = vmatpush.msra.mxu1 %v380_v5  ;;  %428 = vrot.lane.b32.xlu2 %v353_v9, %s1126_s11  ;;  %s1054_s30 = scalar_lea.hbm %s1053_s8, 8  ;;  %p1059_p12 = scmp.lt.s32.totalorder %s1053_s8, %s1348_s6 }
  0x45   : > { %p1055_p1 = scmp.ne.s32.totalorder %s1053_s8, %s1054_s30 }
  0x46   : > { %406 = vmatpush.msra.mxu1 %v379_v6 }
  0x47   : > { %p1056_p3 = pnand %p1055_p1, %p1249_p13 }
  0x48   : > { %551 = vmatpush.msrb.mxu1 %v534_v39 }
  0x49   : > { %p1057_p5 = pneg %p1056_p3 }
  0x4a   : > { %552 = vmatpush.msrb.mxu1 %v533_v40 }
  0x4b   : > { %384 = vrot.lane.b32.xlu0 %v353_v9, %s1125_s29  ;;  %839 = vrot.lane.b32.xlu1 %v828_v7, %s1126_s11 }
  0x4c   : > { %844 = vrot.lane.b32.xlu2 %v833_v8, %s1126_s11  ;;  %553 = vmatpush.msrb.mxu1 %v532_v45  ;;  %s1058_s11 = scalar_lea.hbm %s1348_s6, 16 }
  0x4d   : > { %p1060_p8 = scmp.lt.s32.totalorder %s1058_s11, %s1054_s30 }
  0x4e   : > { %554 = vmatpush.msrb.mxu1 %v531_v46 }
  0x4f   : > { %p1061_p7 = por %p1060_p8, %p1059_p12 }
  0x51   : > { %p1062_p9 = pnand %p1061_p7, %p1057_p5 }
  0x53   : > { %467 = vrot.lane.b32.xlu1 %v353_v9, %s1127_s9  ;;  %849 = vrot.lane.b32.xlu0 %v828_v7, %s1127_s9 }
  0x54   : > { %854 = vrot.lane.b32.xlu2 %v833_v8, %s1127_s9 }
  0x9e   : > { %v429_v23 = vpop.permute.xlu2 %428 }
  0xa6   : > { %v845_v27 = vpop.permute.xlu2 %844 }
  0xa7   : > { %v846_v28 = vunpack.i.l.bf16 %v845_v27  ;;  %v847_v29 = vunpack.i.h.bf16 %v845_v27 }
  0xae   : > { %v855_v34 = vpop.permute.xlu2 %854 }
  0xaf   : > { %v856_v37 = vunpack.i.l.bf16 %v855_v34  ;;  %v857_v38 = vunpack.i.h.bf16 %v855_v34 }
  0xb5   : > { %v830_v13 = vpop.permute.xlu0 %829  ;;  %v835_v16 = vpop.permute.xlu1 %834 }
  0xb6   : > { %v831_v14 = vunpack.i.l.bf16 %v830_v13  ;;  %v832_v15 = vunpack.i.h.bf16 %v830_v13  ;;  %v836_v17 = vunpack.i.l.bf16 %v835_v16  ;;  %v837_v18 = vunpack.i.h.bf16 %v835_v16 }
  0xb8   : > { %446 = vmatpush.msra.mxu2 %v831_v14 }
  0xba   : > { %447 = vmatpush.msra.mxu2 %v832_v15 }
  0xbc   : > { %448 = vmatpush.msra.mxu2 %v836_v17 }
  0xbd   : > { %v385_v19 = vpop.permute.xlu0 %384  ;;  %v840_v24 = vpop.permute.xlu1 %839 }
  0xbe   : > { %449 = vmatpush.msra.mxu2 %v837_v18  ;;  %v841_v25 = vunpack.i.l.bf16 %v840_v24  ;;  %v842_v26 = vunpack.i.h.bf16 %v840_v24 }
  0xbf   : > { %v375_v10 = vpop.f32.mrf.mxu0 }
  0xc0   : > { %v376_v11 = vadd.f32 %v375_v10, %v353_v9  ;;  %485 = vmatpush.msra.mxu3 %v841_v25 }
  0xc2   : > { %v378_v12 = vmax.f32 %v376_v11, 0.0  ;;  %486 = vmatpush.msra.mxu3 %v842_v26 }
  0xc4   : > { %717 = vmatmul.msk.f32.vlgmr.msra.gmra.mxu1 %vm387_vm1, %v378_v12  ;;  %487 = vmatpush.msra.mxu3 %v846_v28 }
  0xc5   : > { %v850_v33 = vpop.permute.xlu0 %849  ;;  %v468_v41 = vpop.permute.xlu1 %467 }
  0xc6   : > { %488 = vmatpush.msra.mxu3 %v847_v29  ;;  %v852_v35 = vunpack.i.h.bf16 %v850_v33  ;;  %v851_v36 = vunpack.i.l.bf16 %v850_v33 }
  0xc8   : > { %522 = vmatpush.msrb.mxu0 %v851_v36 }
  0xca   : > { %523 = vmatpush.msrb.mxu0 %v852_v35 }
  0xcc   : > { %524 = vmatpush.msrb.mxu0 %v856_v37 }
  0xce   : > { %525 = vmatpush.msrb.mxu0 %v857_v38 }
 0x141   : > { %v408_v20 = vpop.f32.mrf.mxu1 }
 0x142   : > { %v409_v21 = vadd.f32 %v408_v20, %v385_v19 }
 0x144   : > { %v411_v22 = vmax.f32 %v409_v21, 0.0 }
 0x146   : > { %718 = vmatmul.msk.f32.vlgmr.msra.gmra.mxu2 %vm387_vm1, %v411_v22 }
 0x1c9   : > { %v451_v30 = vpop.f32.mrf.mxu2 }
 0x1ca   : > { %v452_v31 = vadd.f32 %v451_v30, %v429_v23 }
 0x1cc   : > { %v454_v32 = vmax.f32 %v452_v31, 0.0 }
 0x1ce   : > { %719 = vmatmul.msk.f32.vlgmr.msra.gmra.mxu3 %vm387_vm1, %v454_v32 }
 0x251   : > { %v490_v42 = vpop.f32.mrf.mxu3 }
 0x252   : > { %v491_v43 = vadd.f32 %v490_v42, %v468_v41 }
 0x254   : > { %v493_v44 = vmax.f32 %v491_v43, 0.0 }
 0x256   : > { %720 = vmatmul.msk.f32.vlgmr.msrb.gmra.mxu0 %vm387_vm1, %v493_v44 }
 0x2d3   : > { %v527_v48 = vpop.f32.mrf.mxu0 }
 0x2d4   : > { %v528_v49 = vadd.f32 %v527_v48, %v494_v47 }
 0x2d6   : > { %v530_v50 = vmax.f32 %v528_v49, 0.0 }
 0x2d8   : > { %721 = vmatmul.msk.f32.vlgmr.msrb.gmra.mxu1 %vm387_vm1, %v530_v50 }
 0x355   : > { %v556_v52 = vpop.f32.mrf.mxu1 }
 0x356   : > { %v557_v54 = vadd.f32 %v556_v52, %v535_v51 }
 0x358   : > { %v561_v56 = vmax.f32 %v557_v54, %v559_v53 }
 0x35a   : > { %v562_v57 = vmin.f32 %v561_v56, %v560_v55 }
 0x35c   : > { %563 = vst [vmem:[%s349_s27] sm:$0xff] %v562_v57 }
 0x35d   : > { %1065 = shalt.err (!%p1062_p9)
}
 0x35e   : > { %748 = dma.vmem_to_hbm [thread:$0]  (%p1249_p13), %s578_s26, 128, %s580_s7, %s565_s28  }
 0x35f PF: > { %s591_s18 = sand.u32 1, %s1104_s21   ;;  %p1355_p10 = scmp.ge.s32.totalorder %s1116_s24, 2 }
 0x360   : > { %s592_s12 = scalar_lea.sflag [#allocation4], %s591_s18 }
 0x361   : > { %p771_p11 = pnand %p1355_p10, %p1254_p4 }
 0x363   : > { %p772_p0 = pneg %p771_p11 }
 0x365   : > { %1099 = dma.done.wait (%p772_p0), %s592_s12, 128  }
 0x366   : > { %1101 = vsyncadd (%p772_p0), %s592_s12, 4294967168  ;;  %p22_p2 = scmp.ge.s32.totalorder %s1229_s15, 4   ;;  %s1356_s21 = smov %s1108_s22 }
 0x367   : > { %s1357_s22 = smov %s1112_s23  ;;  %s1358_s23 = smov %s1241_s20 }
 0x368   : > { %s1359_s24 = smov %s1229_s15  ;;  %24 = sbr.rel (!%p22_p2) target bundleno = 8 (0x8), region = 109 }
 0x36d   :  { %598 = vsyncpa [#allocation3], 1 }
 0x36e   :  { %600 = vsyncpa [#allocation3 + $0x1], 1 }
 0x36f   :  { %601 = vsyncpa [#allocation6], 1 }
 0x370   :  { %602 = vsyncpa [#allocation9], 1 }
 0x371   :  { %603 = vsyncpa [#allocation12], 1 }
 0x372   :  { %604 = vsyncpa [#allocation4], 1 }
 0x373   :  { %606 = vsyncpa [#allocation4 + $0x1], 1 }

</bundles_post_ra>
